<compile_context>
chip_gen: v5e
topology: v5e:2x2
jax: 0.10.0
libtpu: 0.0.40
codegen_flags: <defaults>
</compile_context>

<pallas_src>
import inspect
import math

import jax
import jax.numpy as jnp
from jax.experimental import pallas as pl
from jax.experimental.pallas import tpu as pltpu


def _round_up(x, m):
    return ((x + m - 1) // m) * m


def _supports_pipeline_mode():
    """Feature check for pl.Buffered single-buffering of constant blocks."""
    if not hasattr(pl, "Buffered"):
        return False
    try:
        sig_params = inspect.signature(pl.BlockSpec).parameters
    except (TypeError, ValueError):
        sig_params = {}
    if "pipeline_mode" not in sig_params:
        return False
    try:
        pl.BlockSpec((8, 128), lambda i: (0, 0), pipeline_mode=pl.Buffered(1))
    except TypeError:
        return False
    return True


_HAS_BUFFERED = _supports_pipeline_mode()


# ------------------------------ kernels -------------------------------------


def class_block_kernel(x_ref, w1_ref, b1_ref, w2_ref, b2_ref, o_ref):
    # Cast activations to bf16 in-register (MXU-native), accumulate in f32.
    x = x_ref[...].astype(jnp.bfloat16)
    # add_block Linear (+ folded BatchNorm).
    h = jnp.dot(x, w1_ref[...], preferred_element_type=jnp.float32)
    h = h + b1_ref[...]
    # relu=False -> no LeakyReLU; Dropout(p=0.5) -> identity in eval mode.
    # classifier Linear.
    out = jnp.dot(h.astype(jnp.bfloat16), w2_ref[...],
                  preferred_element_type=jnp.float32)
    o_ref[...] = (out + b2_ref[...]).astype(o_ref.dtype)


def class_block_fused_kernel(x_ref, w_ref, b_ref, o_ref):
    # Collapsed head: single affine map (Linear+BN+Dropout(eval)+Linear).
    x = x_ref[...].astype(jnp.bfloat16)
    out = jnp.dot(x, w_ref[...], preferred_element_type=jnp.float32)
    o_ref[...] = (out + b_ref[...]).astype(o_ref.dtype)


# --------------------------- one-time weight prep ----------------------------


def prepare_class_block_params(params, *, eps=1e-5, collapse_matmuls=False):
    """One-time (model-load) preprocessing.

    Folds BatchNorm1d (eval mode / running stats) into the first Linear, pads
    the class dimension to a lane-dense multiple of 128 and casts the weights
    to bf16.  Call once and reuse the result across forward calls so none of
    this runs in the per-call path.
    """
    w1 = params["w1"].astype(jnp.float32)
    b1 = params["b1"].astype(jnp.float32)
    w2 = params["w2"].astype(jnp.float32)
    b2 = params["b2"].astype(jnp.float32)
    D, H = w1.shape
    C = w2.shape[1]
    C_pad = _round_up(C, 128)

    scale = params["gamma"] * jax.lax.rsqrt(params["running_var"] + jnp.float32(eps))
    w1_eff = w1 * scale[None, :]
    b1_eff = (b1 - params["running_mean"]) * scale + params["beta"]

    if C_pad != C:
        w2 = jnp.pad(w2, ((0, 0), (0, C_pad - C)))
        b2 = jnp.pad(b2, (0, C_pad - C))

    if collapse_matmuls:
        # Purely affine head (relu=False, eval dropout) -> single matmul.
        # Worthwhile on HBM-bound v6e; skip on MXU-bound v5e/v7x.
        w_comb = (w1_eff @ w2).astype(jnp.bfloat16)
        b_comb = (b1_eff @ w2 + b2).astype(jnp.float32)
        return dict(mode="fused", D=D, H=H, C=C, C_pad=C_pad,
                    w=w_comb, b=b_comb.reshape(1, C_pad))

    return dict(mode="two_matmul", D=D, H=H, C=C, C_pad=C_pad,
                w1=w1_eff.astype(jnp.bfloat16),
                b1=b1_eff.astype(jnp.float32).reshape(1, H),
                w2=w2.astype(jnp.bfloat16),
                b2=b2.astype(jnp.float32).reshape(1, C_pad))


# ------------------------------- forward ------------------------------------


def class_block_forward(x, prepared, *, batch_tile=None, out_dtype=None):
    B, D = x.shape
    assert D == prepared["D"], (D, prepared["D"])
    H, C, C_pad = prepared["H"], prepared["C"], prepared["C_pad"]
    out_dtype = x.dtype if out_dtype is None else out_dtype

    if batch_tile is None:
        # Large tiles amortize the ~0.35us per-grid-step overhead and approach
        # the HBM roofline; 512 rows keeps the footprint well under v7x's 64 MiB.
        batch_tile = min(_round_up(B, 8), 512)
        # v7x has 2 TensorCores: keep >= 2 parallel grid steps when the batch
        # allows it (the extra grid step is essentially free on 1-TC v5e/v6e).
        if (_round_up(B, batch_tile) // batch_tile < 2
                and batch_tile >= 16 and batch_tile % 16 == 0):
            batch_tile //= 2

    B_pad = _round_up(B, batch_tile)
    x_p = x if B_pad == B else jnp.pad(x, ((0, B_pad - B), (0, 0)))
    grid = (B_pad // batch_tile,)

    w_kw = dict(pipeline_mode=pl.Buffered(1)) if _HAS_BUFFERED else {}
    wbuf = 1 if _HAS_BUFFERED else 2
    x_itemsize = jnp.dtype(x_p.dtype).itemsize
    out_itemsize = jnp.dtype(out_dtype).itemsize

    if prepared["mode"] == "fused":
        weight_bytes = D * C_pad * 2 + C_pad * 4
        in_specs = [
            pl.BlockSpec((batch_tile, D), lambda i: (i, 0)),            # x tile
            pl.BlockSpec((D, C_pad), lambda i: (0, 0), **w_kw),         # W_comb
            pl.BlockSpec((1, C_pad), lambda i: (0, 0), **w_kw),         # b_comb
        ]
        operands = (x_p, prepared["w"], prepared["b"])
        kernel = class_block_fused_kernel
    else:
        weight_bytes = D * H * 2 + H * 4 + H * C_pad * 2 + C_pad * 4
        in_specs = [
            pl.BlockSpec((batch_tile, D), lambda i: (i, 0)),            # x tile
            pl.BlockSpec((D, H), lambda i: (0, 0), **w_kw),             # W1 (BN folded)
            pl.BlockSpec((1, H), lambda i: (0, 0), **w_kw),             # b1 (BN folded)
            pl.BlockSpec((H, C_pad), lambda i: (0, 0), **w_kw),         # W2 (padded)
            pl.BlockSpec((1, C_pad), lambda i: (0, 0), **w_kw),         # b2 (padded)
        ]
        operands = (x_p, prepared["w1"], prepared["b1"],
                    prepared["w2"], prepared["b2"])
        kernel = class_block_kernel

    # Tight, computed VMEM budget: streaming x/out tiles double-buffered,
    # weights single-buffered (or double if Buffered(1) unsupported), +4 MiB
    # headroom for compiler scratch.  Never request the full physical VMEM.
    vmem_bytes = (2 * batch_tile * D * x_itemsize
                  + 2 * batch_tile * C_pad * out_itemsize
                  + wbuf * weight_bytes
                  + (4 << 20))
    vmem_bytes = max(int(vmem_bytes), 16 << 20)

    out = pl.pallas_call(
        kernel,
        out_shape=jax.ShapeDtypeStruct((B_pad, C_pad), out_dtype),
        grid_spec=pltpu.PrefetchScalarGridSpec(
            num_scalar_prefetch=0,
            grid=grid,
            in_specs=in_specs,
            out_specs=pl.BlockSpec((batch_tile, C_pad), lambda i: (i, 0)),
        ),
        compiler_params=pltpu.CompilerParams(
            dimension_semantics=("parallel",),
            vmem_limit_bytes=vmem_bytes,
        ),
    )(*operands)

    return out[:B, :C]


# ----------------------- init / pure-JAX reference --------------------------


def init_params(key, input_dim, class_num, num_bottleneck):
    k1, k2 = jax.random.split(key)

    # add_block Linear: weights_init_kaiming -> kaiming_normal(mode='fan_out'),
    # PyTorch Linear weight shape is (out, in) => fan_out = num_bottleneck,
    # std = sqrt(2 / num_bottleneck); bias = 0. Stored pre-transposed as (in, out).
    std1 = math.sqrt(2.0 / num_bottleneck)
    w1 = jax.random.normal(k1, (input_dim, num_bottleneck), jnp.float32) * std1
    b1 = jnp.zeros((num_bottleneck,), jnp.float32)

    # BatchNorm1d default affine init (the kaiming init fn only matches
    # InstanceNorm1d): gamma = 1, beta = 0, running_mean = 0, running_var = 1.
    gamma = jnp.ones((num_bottleneck,), jnp.float32)
    beta = jnp.zeros((num_bottleneck,), jnp.float32)
    running_mean = jnp.zeros((num_bottleneck,), jnp.float32)
    running_var = jnp.ones((num_bottleneck,), jnp.float32)

    # classifier Linear: weights_init_classifier -> normal(std=0.001), bias = 0.
    w2 = jax.random.normal(k2, (num_bottleneck, class_num), jnp.float32) * 0.001
    b2 = jnp.zeros((class_num,), jnp.float32)

    return dict(w1=w1, b1=b1, gamma=gamma, beta=beta,
                running_mean=running_mean, running_var=running_var,
                w2=w2, b2=b2)


def reference_forward(x, params, eps=1e-5):
    h = x @ params["w1"] + params["b1"]
    h = (h - params["running_mean"]) * (
        params["gamma"] / jnp.sqrt(params["running_var"] + eps)) + params["beta"]
    return h @ params["w2"] + params["b2"]


if __name__ == "__main__":
    # Small shapes consistent with ClassBlock(input_dim, class_num, num_bottleneck).
    B, INPUT_DIM, NUM_BOTTLENECK, CLASS_NUM = 8, 256, 128, 16

    key = jax.random.PRNGKey(0)
    kx, kp = jax.random.split(key)

    x = jax.random.normal(kx, (B, INPUT_DIM), jnp.float32)
    params = init_params(kp, INPUT_DIM, CLASS_NUM, NUM_BOTTLENECK)
    ref = reference_forward(x, params)

    # Default two-matmul head (one-time weight prep, then the kernel call).
    prepared = prepare_class_block_params(params)
    out = jax.block_until_ready(class_block_forward(x, prepared))
    assert out.shape == (B, CLASS_NUM), out.shape
    # bf16 matmul operands with f32 accumulation vs pure-f32 reference.
    assert jnp.allclose(out, ref, rtol=5e-2, atol=5e-3), "mismatch (two_matmul)"

    # Collapsed single-matmul variant (v6e option).
    prepared_fused = prepare_class_block_params(params, collapse_matmuls=True)
    out_f = jax.block_until_ready(class_block_forward(x, prepared_fused))
    assert out_f.shape == (B, CLASS_NUM), out_f.shape
    assert jnp.allclose(out_f, ref, rtol=5e-2, atol=5e-3), "mismatch (fused)"

    print("KERNEL_OK")
</pallas_src>

<mosaic_0001>
module attributes {stable_mosaic.version = 11 : i64} {
  func.func @class_block_kernel(%arg0: i32, %arg1: memref<8x256xf32, #tpu.memory_space<vmem>>, %arg2: memref<256x128xbf16, #tpu.memory_space<vmem>>, %arg3: memref<1x128xf32, #tpu.memory_space<vmem>>, %arg4: memref<128x128xbf16, #tpu.memory_space<vmem>>, %arg5: memref<1x128xf32, #tpu.memory_space<vmem>>, %arg6: memref<8x128xf32, #tpu.memory_space<vmem>>) attributes {dimension_semantics = [#tpu.dimension_semantics<parallel>], iteration_bounds = array<i64: 1>, scalar_prefetch = 0 : i64, scratch_operands = 0 : i64, tpu.core_type = #tpu.core_type<tc>, window_params = [{transform_indices = @transform_0, window_bounds = array<i64: 8, 256>}, {pipeline_mode = #tpu.pipeline_mode<synchronous>, transform_indices = @transform_1, window_bounds = array<i64: 256, 128>}, {pipeline_mode = #tpu.pipeline_mode<synchronous>, transform_indices = @transform_2, window_bounds = array<i64: 1, 128>}, {pipeline_mode = #tpu.pipeline_mode<synchronous>, transform_indices = @transform_3, window_bounds = array<i64: 128, 128>}, {pipeline_mode = #tpu.pipeline_mode<synchronous>, transform_indices = @transform_4, window_bounds = array<i64: 1, 128>}, {transform_indices = @transform_5, window_bounds = array<i64: 8, 128>}]} {
    %c0 = arith.constant 0 : index
    %c0_0 = arith.constant 0 : index
    %0 = vector.load %arg1[%c0, %c0_0] : memref<8x256xf32, #tpu.memory_space<vmem>>, vector<8x256xf32>
    %1 = arith.truncf %0 : vector<8x256xf32> to vector<8x256xbf16>
    %c0_1 = arith.constant 0 : index
    %c0_2 = arith.constant 0 : index
    %2 = vector.load %arg2[%c0_1, %c0_2] : memref<256x128xbf16, #tpu.memory_space<vmem>>, vector<256x128xbf16>
    %cst = arith.constant dense<0.000000e+00> : vector<8x128xf32>
    %3 = tpu.matmul %1, %2, %cst {dimension_numbers = #tpu.dot_dimension_numbers<[1], [0], [0], [1], [0, 0, 1, 1], [], []>} : vector<8x256xbf16>, vector<256x128xbf16>, vector<8x128xf32> -> vector<8x128xf32>
    %c0_3 = arith.constant 0 : index
    %c0_4 = arith.constant 0 : index
    %4 = vector.load %arg3[%c0_3, %c0_4] : memref<1x128xf32, #tpu.memory_space<vmem>>, vector<1x128xf32>
    %5 = vector.broadcast %4 : vector<1x128xf32> to vector<8x128xf32>
    %6 = arith.addf %3, %5 : vector<8x128xf32>
    %7 = arith.truncf %6 : vector<8x128xf32> to vector<8x128xbf16>
    %c0_5 = arith.constant 0 : index
    %c0_6 = arith.constant 0 : index
    %8 = vector.load %arg4[%c0_5, %c0_6] : memref<128x128xbf16, #tpu.memory_space<vmem>>, vector<128x128xbf16>
    %cst_7 = arith.constant dense<0.000000e+00> : vector<8x128xf32>
    %9 = tpu.matmul %7, %8, %cst_7 {dimension_numbers = #tpu.dot_dimension_numbers<[1], [0], [0], [1], [0, 0, 1, 1], [], []>} : vector<8x128xbf16>, vector<128x128xbf16>, vector<8x128xf32> -> vector<8x128xf32>
    %c0_8 = arith.constant 0 : index
    %c0_9 = arith.constant 0 : index
    %10 = vector.load %arg5[%c0_8, %c0_9] : memref<1x128xf32, #tpu.memory_space<vmem>>, vector<1x128xf32>
    %11 = vector.broadcast %10 : vector<1x128xf32> to vector<8x128xf32>
    %12 = arith.addf %9, %11 : vector<8x128xf32>
    %c0_10 = arith.constant 0 : index
    %c0_11 = arith.constant 0 : index
    %13 = vector.load %arg6[%c0_10, %c0_11] : memref<8x128xf32, #tpu.memory_space<vmem>>, vector<8x128xf32>
    tpu.vector_store %arg6[%c0_10, %c0_11], %12 {strides = array<i32>} : memref<8x128xf32, #tpu.memory_space<vmem>>, vector<8x128xf32>,
    return
  }
  func.func @transform_0(%arg0: i32) -> (i32, i32) {
    %c0_i32 = arith.constant 0 : i32
    %c0_i32_0 = arith.constant 0 : i32
    return %arg0, %c0_i32 : i32, i32
  }
  func.func @transform_1(%arg0: i32) -> (i32, i32) {
    %c0_i32 = arith.constant 0 : i32
    %c0_i32_0 = arith.constant 0 : i32
    %c0_i32_1 = arith.constant 0 : i32
    return %c0_i32, %c0_i32_0 : i32, i32
  }
  func.func @transform_2(%arg0: i32) -> (i32, i32) {
    %c0_i32 = arith.constant 0 : i32
    %c0_i32_0 = arith.constant 0 : i32
    %c0_i32_1 = arith.constant 0 : i32
    return %c0_i32, %c0_i32_0 : i32, i32
  }
  func.func @transform_3(%arg0: i32) -> (i32, i32) {
    %c0_i32 = arith.constant 0 : i32
    %c0_i32_0 = arith.constant 0 : i32
    %c0_i32_1 = arith.constant 0 : i32
    return %c0_i32, %c0_i32_0 : i32, i32
  }
  func.func @transform_4(%arg0: i32) -> (i32, i32) {
    %c0_i32 = arith.constant 0 : i32
    %c0_i32_0 = arith.constant 0 : i32
    %c0_i32_1 = arith.constant 0 : i32
    return %c0_i32, %c0_i32_0 : i32, i32
  }
  func.func @transform_5(%arg0: i32) -> (i32, i32) {
    %c0_i32 = arith.constant 0 : i32
    %c0_i32_0 = arith.constant 0 : i32
    return %arg0, %c0_i32 : i32, i32
  }
}

</mosaic_0001>

<bundles_post_ra>
// kernel: tpu_custom_call.1
= control target key start
LH: loop header
LB: loop body
LE: loop exit
PB: predicated region body
PF: predicated region fallthrough
CT: control target
= control target key end

     0   :  { %10 = vsyncpa [#allocation3], 0  ;;  %s613_s0 = inlined_call_operand.hbm [shape: f32[8,256], index: 0, kind: input, shape index: {}]   ;;  %s614_s1 = inlined_call_operand.hbm [shape: bf16[256,128], index: 1, kind: input, shape index: {}]   ;;  %s615_s2 = inlined_call_operand.vmem [shape: f32[1,128], index: 2, kind: input, shape index: {}]   ;;  %s616_s3 = inlined_call_operand.hbm [shape: bf16[128,128], index: 3, kind: input, shape index: {}]   ;;  %s617_s4 = inlined_call_operand.vmem [shape: f32[1,128], index: 4, kind: input, shape index: {}]   ;;  %s618_s5 = inlined_call_operand.hbm [shape: f32[8,128], index: 5, kind: output, shape index: {}]  }
   0x1   :  { %11 = vsyncpa [#allocation6], 0  ;;  %s28_s20 = sshll.u32 %s614_s1, 4  ;;  %s29_s20 = int_to_ptr.hbm [resolvable:$true] %s28_s20 }
   0x2   :  { %12 = vsyncpa [#allocation4], 0  ;;  %s559_s21 = smov [#allocation5]   ;;  %s18_s25 = sshll.u32 %s613_s0, 4  ;;  %s19_s25 = int_to_ptr.hbm [resolvable:$true] %s18_s25 }
   0x3   :  { %s30_s22 = sshll.u32 %s559_s21, 4  ;;  %s560_s26 = smov 64   ;;  %s31_s22 = int_to_ptr.vmem [resolvable:$true] %s30_s22 }
   0x4   :  { %s561_s27 = smov 4   ;;  %s562_s28 = smov [#allocation2]  }
   0x5   :  { %36 = dma.hbm_to_vmem [thread:$0]  %s29_s20, 2048, %s31_s22, [#allocation6], %s560_s26, %s560_s26, %s561_s27  }
   0x6   :  { %s20_s29 = sshll.u32 %s562_s28, 4  ;;  %s43_s7 = sshll.u32 %s616_s3, 4  ;;  %s21_s29 = int_to_ptr.vmem [resolvable:$true] %s20_s29  ;;  %s44_s7 = int_to_ptr.hbm [resolvable:$true] %s43_s7 }
   0x7   :  { %23 = dma.hbm_to_vmem [thread:$0]  %s19_s25, 256, %s21_s29, [#allocation3]  }
   0x8   :  { %s563_s1 = smov [#allocation7]  }
   0x9   :  { %s45_s8 = sshll.u32 %s563_s1, 4  ;;  %s46_s8 = int_to_ptr.vmem [resolvable:$true] %s45_s8 }
   0xa   :  { %51 = dma.hbm_to_vmem [thread:$0]  %s44_s7, 1024, %s46_s8, [#allocation6], %s560_s26, %s560_s26, %s561_s27  }
   0xb   :  { %553 = dma.done.wait [#allocation3], 256  }
   0xc   :  { %554 = vsyncadd [#allocation3], 4294967040 }
   0xd   :  { %555 = dma.done.wait [#allocation6], 3072  }
   0xe   :  { %556 = vsyncadd [#allocation6], 4294964224  ;;  %v432_v0 = vld [vmem:[#allocation5 + $0x38] sm:$0xff]  ;;  %v431_v2 = vld [vmem:[#allocation5 + $0x30] sm:$0xff]  ;;  %s564_s11 = smov [#allocation8]   ;;  %s318_s15 = sshll.u32 %s618_s5, 4  ;;  %s319_s15 = int_to_ptr.hbm [resolvable:$true] %s318_s15 }
   0xf   :  { %v440_v1 = vld [vmem:[#allocation5 + $0x78] sm:$0xff]  ;;  %202 = vmatpush.bf16.msra.mxu0 %v432_v0  ;;  %v439_v3 = vld [vmem:[#allocation5 + $0x70] sm:$0xff]  ;;  %v430_v4 = vld [vmem:[#allocation5 + $0x28] sm:$0xff]  ;;  %s316_s12 = sshll.u32 %s564_s11, 4  ;;  %s317_s12 = int_to_ptr.vmem [resolvable:$true] %s316_s12 }
  0x10   :  { %215 = vmatpush.bf16.msra.mxu1 %v440_v1  ;;  %v438_v5 = vld [vmem:[#allocation5 + $0x68] sm:$0xff]  ;;  %v448_v6 = vld [vmem:[#allocation7 + $0x38] sm:$0xff]  ;;  %v447_v7 = vld [vmem:[#allocation7 + $0x30] sm:$0xff] }
  0x11   :  { %297 = vmatpush.bf16.msra.mxu2 %v448_v6  ;;  %v429_v8 = vld [vmem:[#allocation5 + $0x20] sm:$0xff]  ;;  %v446_v10 = vld [vmem:[#allocation7 + $0x28] sm:$0xff]  ;;  %v428_v11 = vld [vmem:[#allocation5 + $0x18] sm:$0xff] }
  0x12   :  { %v437_v9 = vld [vmem:[#allocation5 + $0x60] sm:$0xff]  ;;  %v436_v12 = vld [vmem:[#allocation5 + $0x58] sm:$0xff]  ;;  %v427_v14 = vld [vmem:[#allocation5 + $0x10] sm:$0xff] }
  0x13   :  { %203 = vmatpush.bf16.msra.mxu0 %v431_v2  ;;  %v445_v13 = vld [vmem:[#allocation7 + $0x20] sm:$0xff]  ;;  %v435_v15 = vld [vmem:[#allocation5 + $0x50] sm:$0xff]  ;;  %v444_v16 = vld [vmem:[#allocation7 + $0x18] sm:$0xff] }
  0x14   :  { %216 = vmatpush.bf16.msra.mxu1 %v439_v3  ;;  %v426_v17 = vld [vmem:[#allocation5 + $0x8] sm:$0xff]  ;;  %v443_v19 = vld [vmem:[#allocation7 + $0x10] sm:$0xff]  ;;  %v425_v20 = vld [vmem:[#allocation5] sm:$0xff] }
  0x15   :  { %298 = vmatpush.bf16.msra.mxu2 %v447_v7  ;;  %v434_v18 = vld [vmem:[#allocation5 + $0x48] sm:$0xff]  ;;  %v433_v21 = vld [vmem:[#allocation5 + $0x40] sm:$0xff]  ;;  %v66_v22 = vld [vmem:[#allocation2] sm:$0xff] }
  0x16   :  { %v67_v23 = vld [vmem:[#allocation2 + $0x8] sm:$0xff]  ;;  %v68_v24 = vpack.c.bf16 %v66_v22, %v66_v22  ;;  %v442_v26 = vld [vmem:[#allocation7 + $0x8] sm:$0xff]  ;;  %v441_v27 = vld [vmem:[#allocation7] sm:$0xff] }
  0x17   :  { %204 = vmatpush.bf16.msra.mxu0 %v430_v4  ;;  %v69_v25 = vpack.c.bf16 %v67_v23, %v67_v23  ;;  %v455_v28 = vld [vmem:[%s615_s2] ss:$0 sm:$0xff] }
  0x18   :  { %217 = vmatpush.bf16.msra.mxu1 %v438_v5  ;;  %v456_v36 = vld [vmem:[%s617_s4] ss:$0 sm:$0xff] }
  0x19   :  { %299 = vmatpush.bf16.msra.mxu2 %v446_v10 }
  0x1b   :  { %205 = vmatpush.bf16.msra.mxu0 %v429_v8 }
  0x1c   :  { %218 = vmatpush.bf16.msra.mxu1 %v437_v9 }
  0x1d   :  { %300 = vmatpush.bf16.msra.mxu2 %v445_v13 }
  0x1f   :  { %206 = vmatpush.bf16.msra.mxu0 %v428_v11 }
  0x20   :  { %219 = vmatpush.bf16.msra.mxu1 %v436_v12 }
  0x21   :  { %301 = vmatpush.bf16.msra.mxu2 %v444_v16 }
  0x23   :  { %207 = vmatpush.bf16.msra.mxu0 %v427_v14 }
  0x24   :  { %220 = vmatpush.bf16.msra.mxu1 %v435_v15 }
  0x25   :  { %302 = vmatpush.bf16.msra.mxu2 %v443_v19 }
  0x27   :  { %208 = vmatpush.bf16.msra.mxu0 %v426_v17 }
  0x28   :  { %221 = vmatpush.bf16.msra.mxu1 %v434_v18 }
  0x29   :  { %303 = vmatpush.bf16.msra.mxu2 %v442_v26 }
  0x2b   :  { %209 = vmatpush.bf16.msra.mxu0 %v425_v20 }
  0x2c   :  { %222 = vmatpush.bf16.msra.mxu1 %v433_v21 }
  0x2d   :  { %304 = vmatpush.bf16.msra.mxu2 %v441_v27 }
  0x2e   :  { %210 = vmatmul.bf16.vlgmr.msra.gmra.mxu0 %v68_v24 }
  0x2f   :  { %223 = vmatmul.bf16.vlgmr.msra.gmra.mxu1 %v69_v25 }
  0xab   :  { %v211_v29 = vpop.f32.mrf.mxu0 }
  0xac   :  { %v224_v30 = vpop.f32.mrf.mxu1  ;;  %v212_v31 = vadd.f32 %v455_v28, %v211_v29 }
  0xae   :  { %v225_v32 = vadd.f32 %v224_v30, %v212_v31 }
  0xb0   :  { %v228_v33 = vpack.c.bf16 %v225_v32, %v225_v32 }
  0xb2   :  { %305 = vmatmul.bf16.vlgmr.msra.gmra.mxu2 %v228_v33 }
  0xb3   :  { %v213_v34 = vpop.f32.mrf.mxu0 }
  0xb4   :  { %v226_v35 = vpop.f32.mrf.mxu1 }
 0x135   :  { %v306_v37 = vpop.f32.mrf.mxu2 }
 0x136   :  { %v307_v38 = vadd.f32 %v456_v36, %v306_v37 }
 0x138   :  { %310 = vst [vmem:[#allocation8] sm:$0xff] %v307_v38 }
 0x139   :  { %321 = dma.vmem_to_hbm [thread:$0]  %s317_s12, 128, %s319_s15, [#allocation4]  }
 0x13d   :  { %v308_v39 = vpop.f32.mrf.mxu2 }
 0x13e   :  { %557 = dma.done.wait [#allocation4], 128  }
 0x13f   :  { %558 = vsyncadd [#allocation4], 4294967168 }
 0x140   :  { %326 = vsyncpa [#allocation3], 1 }
 0x141   :  { %327 = vsyncpa [#allocation6], 1 }
 0x142   :  { %328 = vsyncpa [#allocation4], 1 }

</bundles_post_ra>
